<compile_context>
chip_gen: v7x
topology: tpu7x:2x2x1
jax: 0.10.0
libtpu: 0.0.40
codegen_flags: <defaults>
</compile_context>

<pallas_src>
import math
from functools import partial

import jax
import jax.numpy as jnp
from jax.experimental import pallas as pl
from jax.experimental.pallas import tpu as pltpu

_LANE = 128
_DEFAULT_WS_W_BYTES = 6 * 1024 * 1024     # weight-stationary if padded W <= this
_DEFAULT_WS_TILE_BYTES = 12 * 1024 * 1024  # budget for double-buffered x/out tiles


def _round_up(x, m):
    return (x + m - 1) // m * m


def _pick_tile(dim, unit, cap):
    """Pick (padded_dim, tile): tile is a multiple of `unit`, tile | padded_dim.
    Avoids collapsing to skinny tiles: only accepts divisor tiles >= cap/2,
    otherwise keeps the big tile and pads the dim up to a multiple of it."""
    dim = max(int(dim), 1)
    cap = max(unit, cap - cap % unit)
    dp0 = _round_up(dim, unit)
    if dp0 <= cap:
        return dp0, dp0
    t = cap
    while t >= max(unit, cap // 2):
        if dp0 % t == 0:
            return dp0, t
        t -= unit
    return _round_up(dp0, cap), cap


def _plan_wn(d_model, n, w_dtype, tn_max, tk_max, max_ws_weight_bytes):
    """Weight-side geometry (independent of M). Returns (path, kp, np_, tk, tn)."""
    w_item = jnp.dtype(w_dtype).itemsize
    kp_ws = _round_up(d_model, _LANE)
    np_ws = _round_up(n, _LANE)
    if kp_ws * np_ws * w_item <= max_ws_weight_bytes:
        return "ws", kp_ws, np_ws, kp_ws, np_ws
    kp, tk = _pick_tile(d_model, _LANE, tk_max)
    np_, tn = _pick_tile(n, _LANE, tn_max)
    return "tiled", kp, np_, tk, tn


# ------------------------------- kernels ------------------------------------


def _ws_kernel_bias(x_ref, w_ref, b_ref, o_ref, *, compute_dtype):
    xv = x_ref[...]
    if compute_dtype is not None and xv.dtype != compute_dtype:
        xv = xv.astype(compute_dtype)            # in-kernel cast, hides under MXU
    acc = jnp.dot(xv, w_ref[...], preferred_element_type=jnp.float32)
    o_ref[...] = (acc + b_ref[...]).astype(o_ref.dtype)


def _ws_kernel_nobias(x_ref, w_ref, o_ref, *, compute_dtype):
    xv = x_ref[...]
    if compute_dtype is not None and xv.dtype != compute_dtype:
        xv = xv.astype(compute_dtype)
    o_ref[...] = jnp.dot(
        xv, w_ref[...], preferred_element_type=jnp.float32
    ).astype(o_ref.dtype)


def _tiled_kernel_bias(x_ref, w_ref, b_ref, o_ref, acc_ref, *, compute_dtype):
    k = pl.program_id(2)

    @pl.when(k == 0)
    def _():
        # Bias folded into the accumulator init -> no epilogue add.
        acc_ref[...] = jnp.broadcast_to(b_ref[...], acc_ref.shape)

    xv = x_ref[...]
    if compute_dtype is not None and xv.dtype != compute_dtype:
        xv = xv.astype(compute_dtype)
    acc_ref[...] += jnp.dot(xv, w_ref[...], preferred_element_type=jnp.float32)

    @pl.when(k == pl.num_programs(2) - 1)
    def _():
        o_ref[...] = acc_ref[...].astype(o_ref.dtype)


def _tiled_kernel_nobias(x_ref, w_ref, o_ref, acc_ref, *, compute_dtype):
    k = pl.program_id(2)

    @pl.when(k == 0)
    def _():
        acc_ref[...] = jnp.zeros_like(acc_ref)

    xv = x_ref[...]
    if compute_dtype is not None and xv.dtype != compute_dtype:
        xv = xv.astype(compute_dtype)
    acc_ref[...] += jnp.dot(xv, w_ref[...], preferred_element_type=jnp.float32)

    @pl.when(k == pl.num_programs(2) - 1)
    def _():
        o_ref[...] = acc_ref[...].astype(o_ref.dtype)


# ------------------------------- wrapper -------------------------------------


def prepare_weight(
    weight_t,
    bias,
    *,
    compute_dtype=None,
    tn_max=512,
    tk_max=1024,
    max_ws_weight_bytes=_DEFAULT_WS_W_BYTES,
):
    """Hoist the per-call weight pad + dtype cast (the weight is a constant):
    returns (w_prepped, b_prepped) already laid out the way the kernel wants,
    so linear_transformation does zero per-call XLA work on them."""
    d_model, n = weight_t.shape
    w_dtype = jnp.dtype(compute_dtype) if compute_dtype is not None else weight_t.dtype
    _, kp, np_, _, _ = _plan_wn(d_model, n, w_dtype, tn_max, tk_max, max_ws_weight_bytes)
    w = weight_t.astype(w_dtype)
    if (kp, np_) != (d_model, n):
        w = jnp.pad(w, ((0, kp - d_model), (0, np_ - n)))
    b = None
    if bias is not None:
        b = bias.reshape(1, n).astype(jnp.float32)
        if np_ != n:
            b = jnp.pad(b, ((0, 0), (0, np_ - n)))
    return w, b


def linear_transformation(
    x,
    weight_t,
    bias,
    heads,
    d_k,
    *,
    compute_dtype=None,          # e.g. jnp.bfloat16 on v6e/v7x (f32 accumulation kept)
    tm_max=512,
    tn_max=512,
    tk_max=1024,
    max_ws_weight_bytes=_DEFAULT_WS_W_BYTES,
    ws_tile_budget_bytes=_DEFAULT_WS_TILE_BYTES,
):
    """x: [..., d_model]; weight_t: [d_model, heads*d_k] (= torch W^T) or a
    prepare_weight() result; bias: [heads*d_k], prepared (1, np_), or None.
    Returns [..., heads, d_k]."""
    head_shape = x.shape[:-1]
    d_model = x.shape[-1]
    n = heads * d_k
    m = int(math.prod(head_shape)) if head_shape else 1
    out_dtype = x.dtype
    x_item = jnp.dtype(x.dtype).itemsize
    out_item = jnp.dtype(out_dtype).itemsize
    if compute_dtype is not None:
        compute_dtype = jnp.dtype(compute_dtype)

    x2d = x.reshape(m, d_model)

    # --- tiny-problem fallback: below one MXU tile, XLA's fused GEMM wins. ---
    if m < 8 or n < _LANE or d_model < _LANE:
        w = weight_t[:d_model, :n].astype(jnp.float32)
        y = jnp.dot(x2d.astype(jnp.float32), w, preferred_element_type=jnp.float32)
        if bias is not None:
            y = y + bias.reshape(-1)[:n].astype(jnp.float32)
        return y.astype(out_dtype).reshape(*head_shape, heads, d_k)

    # --- weight-side geometry (shared with prepare_weight) ---
    w_dtype = compute_dtype if compute_dtype is not None else jnp.dtype(weight_t.dtype)
    path, kp, np_, tk, tn = _plan_wn(
        d_model, n, w_dtype, tn_max, tk_max, max_ws_weight_bytes)
    w_item = jnp.dtype(w_dtype).itemsize

    # Weight: skip pad/cast entirely if already prepared.
    w2d = weight_t
    if w2d.shape != (kp, np_) or w2d.dtype != w_dtype:
        w_core = w2d[:d_model, :n].astype(w_dtype)
        w2d = (jnp.pad(w_core, ((0, kp - d_model), (0, np_ - n)))
               if (kp, np_) != (d_model, n) else w_core)

    b2d = None
    if bias is not None:
        if bias.ndim == 2 and bias.shape == (1, np_) and bias.dtype == jnp.float32:
            b2d = bias
        else:
            b1 = bias.reshape(1, -1)[:, :n].astype(jnp.float32)
            b2d = jnp.pad(b1, ((0, 0), (0, np_ - n))) if np_ != n else b1

    # --- M tiling (sublane-aligned for the HBM dtypes actually stored) ---
    m_unit = 8 if (x_item >= 4 and out_item >= 4) else 16
    if path == "ws":
        per_row = 2 * kp * x_item + 2 * np_ * out_item     # double-buffered x + out
        tm_budget = max(m_unit, (ws_tile_budget_bytes // per_row) // m_unit * m_unit)
        mp, tm = _pick_tile(m, m_unit, min(tm_max, tm_budget))
    else:
        mp, tm = _pick_tile(m, m_unit, tm_max)

    # v7x megacore: guarantee >= 2 tiles along the parallel axes (free on v5e/v6e).
    n_parallel = (mp // tm) * (1 if path == "ws" else np_ // tn)
    if n_parallel < 2 and mp > m_unit:
        tm = _round_up((mp + 1) // 2, m_unit)
        mp = _round_up(mp, tm)

    if (mp, kp) != (m, d_model):
        x2d = jnp.pad(x2d, ((0, mp - m), (0, kp - d_model)))

    flops = 2 * mp * kp * np_

    if path == "ws":
        grid = (mp // tm,)
        x_spec = pl.BlockSpec((tm, kp), lambda i: (i, 0))
        w_spec = pl.BlockSpec((kp, np_), lambda i: (0, 0))   # constant block: DMA'd once
        o_spec = pl.BlockSpec((tm, np_), lambda i: (i, 0))
        dims = ("parallel",)
        scratch = ()
        vmem_est = (2 * tm * kp * x_item + 2 * kp * np_ * w_item
                    + 2 * tm * np_ * out_item)
        bytes_acc = mp * kp * x_item + kp * np_ * w_item + mp * np_ * out_item
        if b2d is not None:
            b_spec = pl.BlockSpec((1, np_), lambda i: (0, 0))
            vmem_est += 2 * np_ * 4
            bytes_acc += np_ * 4
            kernel = partial(_ws_kernel_bias, compute_dtype=compute_dtype)
            in_specs = [x_spec, w_spec, b_spec]
            operands = (x2d, w2d, b2d)
        else:
            kernel = partial(_ws_kernel_nobias, compute_dtype=compute_dtype)
            in_specs = [x_spec, w_spec]
            operands = (x2d, w2d)
    else:
        grid = (mp // tm, np_ // tn, kp // tk)
        x_spec = pl.BlockSpec((tm, tk), lambda i, j, kk: (i, kk))
        w_spec = pl.BlockSpec((tk, tn), lambda i, j, kk: (kk, j))
        o_spec = pl.BlockSpec((tm, tn), lambda i, j, kk: (i, j))
        dims = ("parallel", "parallel", "arbitrary")
        scratch = (pltpu.VMEM((tm, tn), jnp.float32),)
        vmem_est = (2 * tm * tk * x_item + 2 * tk * tn * w_item
                    + 2 * tm * tn * out_item + tm * tn * 4)
        bytes_acc = (mp * kp * x_item * (np_ // tn)      # x re-read per N tile
                     + kp * np_ * w_item * (mp // tm)    # W re-read per M tile
                     + mp * np_ * out_item)
        if b2d is not None:
            b_spec = pl.BlockSpec((1, tn), lambda i, j, kk: (0, j))
            vmem_est += 2 * tn * 4
            bytes_acc += np_ * 4 * (mp // tm)
            kernel = partial(_tiled_kernel_bias, compute_dtype=compute_dtype)
            in_specs = [x_spec, w_spec, b_spec]
            operands = (x2d, w2d, b2d)
        else:
            kernel = partial(_tiled_kernel_nobias, compute_dtype=compute_dtype)
            in_specs = [x_spec, w_spec]
            operands = (x2d, w2d)

    # Explicit scoped-VMEM budget: fits v7x's 64 MiB physical, lifts v5e's 16 MiB default.
    vmem_limit = int(min(48 * 1024 * 1024,
                         max(24 * 1024 * 1024, int(vmem_est * 1.25) + (2 << 20))))

    out2d = pl.pallas_call(
        kernel,
        out_shape=jax.ShapeDtypeStruct((mp, np_), out_dtype),
        grid_spec=pltpu.PrefetchScalarGridSpec(
            num_scalar_prefetch=0,
            grid=grid,
            in_specs=in_specs,
            out_specs=o_spec,
            scratch_shapes=scratch,
        ),
        compiler_params=pltpu.CompilerParams(
            dimension_semantics=dims,
            vmem_limit_bytes=vmem_limit,
        ),
        cost_estimate=pl.CostEstimate(
            flops=flops, transcendentals=0, bytes_accessed=int(bytes_acc)),
    )(*operands)

    if (mp, np_) != (m, n):
        out2d = out2d[:m, :n]
    return out2d.reshape(*head_shape, heads, d_k)


def init_linear_params(key, d_model, heads, d_k, bias=True, dtype=jnp.float32):
    """Deterministic init mirroring nn.Linear default (uniform +/- 1/sqrt(fan_in)).
    Weight stored directly as W^T: [d_model, heads*d_k]."""
    out_features = heads * d_k
    k_w, k_b = jax.random.split(key)
    bound = 1.0 / math.sqrt(d_model)
    weight_t = jax.random.uniform(
        k_w, (d_model, out_features), dtype=dtype, minval=-bound, maxval=bound)
    b = (jax.random.uniform(
            k_b, (out_features,), dtype=dtype, minval=-bound, maxval=bound)
         if bias else None)
    return weight_t, b


if __name__ == "__main__":
    key = jax.random.PRNGKey(0)
    k1, k2, k3, k4, k5, k6, k7, k8 = jax.random.split(key, 8)

    # --- Test 1: tiny module-like shapes -> XLA fallback path (bias, exact f32) ---
    d_model, heads, d_k = 32, 4, 16
    seq, batch = 8, 2
    x = jax.random.normal(k1, (seq, batch, d_model), dtype=jnp.float32)
    w_t, b = init_linear_params(k2, d_model, heads, d_k, bias=True)
    out = jax.block_until_ready(linear_transformation(x, w_t, b, heads, d_k))
    ref = (x.reshape(-1, d_model) @ w_t + b).reshape(seq, batch, heads, d_k)
    assert out.shape == (seq, batch, heads, d_k), out.shape
    assert jnp.allclose(out, ref, atol=1e-4, rtol=1e-4)

    # --- Test 2: Pallas weight-stationary path (bias, f32, M padding + megacore split) ---
    d_model, heads, d_k = 256, 4, 64
    seq, batch = 24, 5                       # m = 120 -> padded / split for 2 TCs
    x = jax.random.normal(k3, (seq, batch, d_model), dtype=jnp.float32)
    w_t, b = init_linear_params(k4, d_model, heads, d_k, bias=True)
    out = jax.block_until_ready(linear_transformation(x, w_t, b, heads, d_k))
    ref = (x.reshape(-1, d_model) @ w_t + b).reshape(seq, batch, heads, d_k)
    assert out.shape == (seq, batch, heads, d_k), out.shape
    assert jnp.allclose(out, ref, atol=2e-3, rtol=2e-3)

    # --- Test 3: forced K-tiled accumulator path (bias folded at k==0, bf16 operands) ---
    d_model, heads, d_k = 768, 4, 64         # n = 256
    seq, batch = 48, 4                        # m = 192
    x = jax.random.normal(k5, (seq, batch, d_model), dtype=jnp.float32)
    w_t, b = init_linear_params(k6, d_model, heads, d_k, bias=True)
    out = linear_transformation(
        x, w_t, b, heads, d_k,
        compute_dtype=jnp.bfloat16,
        max_ws_weight_bytes=0,                # force the tiled (grid-K) path
        tk_max=256, tn_max=128)
    out = jax.block_until_ready(out)
    ref = (x.reshape(-1, d_model) @ w_t + b).reshape(seq, batch, heads, d_k)
    assert out.shape == (seq, batch, heads, d_k), out.shape
    assert jnp.allclose(out, ref, atol=5e-2, rtol=5e-2)

    # --- Test 4: weight-stationary, no bias, bf16, hoisted weight pad/cast ---
    d_model, heads, d_k = 512, 8, 64          # n = 512
    seq, batch = 64, 4                         # m = 256
    x = jax.random.normal(k7, (seq, batch, d_model), dtype=jnp.float32)
    w_t, _ = init_linear_params(k8, d_model, heads, d_k, bias=False)
    w_prepped, _ = prepare_weight(w_t, None, compute_dtype=jnp.bfloat16)
    out = linear_transformation(
        x, w_prepped, None, heads, d_k, compute_dtype=jnp.bfloat16)
    out = jax.block_until_ready(out)
    ref = (x.reshape(-1, d_model) @ w_t).reshape(seq, batch, heads, d_k)
    assert out.shape == (seq, batch, heads, d_k), out.shape
    assert jnp.allclose(out, ref, atol=5e-2, rtol=5e-2)

    print("KERNEL_OK")
</pallas_src>

<mosaic_0001>
module attributes {stable_mosaic.version = 11 : i64} {
  func.func @_ws_kernel_bias(%arg0: i32, %arg1: memref<64x256xf32, #tpu.memory_space<vmem>>, %arg2: memref<256x256xf32, #tpu.memory_space<vmem>>, %arg3: memref<1x256xf32, #tpu.memory_space<vmem>>, %arg4: memref<64x256xf32, #tpu.memory_space<vmem>>) attributes {dimension_semantics = [#tpu.dimension_semantics<parallel>], iteration_bounds = array<i64: 2>, scalar_prefetch = 0 : i64, scratch_operands = 0 : i64, tpu.core_type = #tpu.core_type<tc>, window_params = [{transform_indices = @transform_0, window_bounds = array<i64: 64, 256>}, {pipeline_mode = #tpu.pipeline_mode<synchronous>, transform_indices = @transform_1, window_bounds = array<i64: 256, 256>}, {pipeline_mode = #tpu.pipeline_mode<synchronous>, transform_indices = @transform_2, window_bounds = array<i64: 1, 256>}, {transform_indices = @transform_3, window_bounds = array<i64: 64, 256>}]} {
    %c0 = arith.constant 0 : index
    %c0_0 = arith.constant 0 : index
    %0 = vector.load %arg1[%c0, %c0_0] : memref<64x256xf32, #tpu.memory_space<vmem>>, vector<64x256xf32>
    %c0_1 = arith.constant 0 : index
    %c0_2 = arith.constant 0 : index
    %1 = vector.load %arg2[%c0_1, %c0_2] : memref<256x256xf32, #tpu.memory_space<vmem>>, vector<256x256xf32>
    %cst = arith.constant dense<0.000000e+00> : vector<64x256xf32>
    %2 = tpu.matmul %0, %1, %cst {dimension_numbers = #tpu.dot_dimension_numbers<[1], [0], [0], [1], [0, 0, 1, 1], [], []>} : vector<64x256xf32>, vector<256x256xf32>, vector<64x256xf32> -> vector<64x256xf32>
    %c0_3 = arith.constant 0 : index
    %c0_4 = arith.constant 0 : index
    %3 = vector.load %arg3[%c0_3, %c0_4] : memref<1x256xf32, #tpu.memory_space<vmem>>, vector<1x256xf32>
    %4 = vector.broadcast %3 : vector<1x256xf32> to vector<64x256xf32>
    %5 = arith.addf %2, %4 : vector<64x256xf32>
    %c0_5 = arith.constant 0 : index
    %c0_6 = arith.constant 0 : index
    %6 = vector.load %arg4[%c0_5, %c0_6] : memref<64x256xf32, #tpu.memory_space<vmem>>, vector<64x256xf32>
    tpu.vector_store %arg4[%c0_5, %c0_6], %5 {strides = array<i32>} : memref<64x256xf32, #tpu.memory_space<vmem>>, vector<64x256xf32>,
    return
  }
  func.func @transform_0(%arg0: i32) -> (i32, i32) {
    %c0_i32 = arith.constant 0 : i32
    %c0_i32_0 = arith.constant 0 : i32
    return %arg0, %c0_i32 : i32, i32
  }
  func.func @transform_1(%arg0: i32) -> (i32, i32) {
    %c0_i32 = arith.constant 0 : i32
    %c0_i32_0 = arith.constant 0 : i32
    %c0_i32_1 = arith.constant 0 : i32
    return %c0_i32, %c0_i32_0 : i32, i32
  }
  func.func @transform_2(%arg0: i32) -> (i32, i32) {
    %c0_i32 = arith.constant 0 : i32
    %c0_i32_0 = arith.constant 0 : i32
    %c0_i32_1 = arith.constant 0 : i32
    return %c0_i32, %c0_i32_0 : i32, i32
  }
  func.func @transform_3(%arg0: i32) -> (i32, i32) {
    %c0_i32 = arith.constant 0 : i32
    %c0_i32_0 = arith.constant 0 : i32
    return %arg0, %c0_i32 : i32, i32
  }
}

</mosaic_0001>

<bundles_post_ra>
// kernel: tpu_custom_call.1
= control target key start
LH: loop header
LB: loop body
LE: loop exit
PB: predicated region body
PF: predicated region fallthrough
CT: control target
= control target key end

     0   :  { %8 = vsyncpa [#allocation3], 0  ;;  %s1113_s0 = inlined_call_operand.hbm [shape: f32[128,256], index: 0, kind: input, shape index: {}]   ;;  %s1114_s1 = inlined_call_operand.hbm [shape: f32[256,256], index: 1, kind: input, shape index: {}]   ;;  %s1115_s2 = inlined_call_operand.vmem [shape: f32[1,256], index: 2, kind: input, shape index: {}]   ;;  %s1116_s3 = inlined_call_operand.hbm [shape: f32[128,256], index: 3, kind: output, shape index: {}]  }
   0x1   :  { %10 = vsyncpa [#allocation3 + $0x1], 0 }
   0x2   :  { %11 = vsyncpa [#allocation6], 0 }
   0x3   :  { %12 = vsyncpa [#allocation4], 0 }
   0x4   :  { %14 = vsyncpa [#allocation4 + $0x1], 0  ;;  %s862_s12 = smov 0   ;;  %s864_s13 = smov 0  }
   0x5   :  { %s866_s14 = smov 0   ;;  %s868_s15 = smov 0  }
   0x6 LB: > { %s883_s16 = sadd.s32 4294967295, %s833_s15   ;;  %s526_s17 = sadd.s32 4294967294, %s833_s15   ;;  %s833_s15 = sphi %s868_s15, %s1136_s15   ;;  %s829_s14 = sphi %s866_s14, %s1135_s14   ;;  %s825_s13 = sphi %s864_s13, %s1134_s13   ;;  %s821_s12 = sphi %s862_s12, %s1133_s12  }
   0x7   : > { %p40_p0 = scmp.ne.s32.totalorder %s825_s13, %s821_s12  ;;  %p1117_p1 = scmp.eq.s32.totalorder %s883_s16, 0 }
   0x8   : > { %p112_p3 = scmp.eq.s32.totalorder %s526_s17, 1  ;;  %p527_p5 = scmp.ge.s32.totalorder %s833_s15, 1 }
   0x9   : > { %p892_p4 = por %p1117_p1, %p40_p0  ;;  %p119_p7 = scmp.lt.s32.totalorder %s833_s15, 3 }
   0xa   : > { %p897_p6 = por %p112_p3, %p40_p0  ;;  %s835_s21 = smov [#allocation5]  }
   0xb   : > { %s1120_s18 = scalar_select %p892_p4, 1, 0 }
   0xc   : > { %s1121_s19 = scalar_select %p897_p6, 1, 0 }
   0xd   : > { %p902_p8 = pnand %p527_p5, %p119_p7  ;;  %s131_s22 = sshll.u32 %s835_s21, 4  ;;  %s906_s22 = int_to_ptr.vmem [resolvable:$true] %s131_s22 }
   0xe   : > { %s918_s24 = sadd.s32 1, %s833_s15   ;;  %s27_s25 = sadd.s32 1, %s829_s14 }
   0xf   : > { %s1122_s20 = scalar_select %p902_p8, 1, 0 }
  0x10   : > { %p652_p9 = pneg %p902_p8  ;;  %s24_s26 = ssub.s32 %s833_s15, %s918_s24 }
  0x11   : > { %s705_s29 = scalar_lea.hbm %s1114_s1, 8192 }
  0x12   : > { %p913_p11 = pnand %p652_p9, %p1117_p1  ;;  %p706_p12 = scmp.ne.s32.totalorder %s1114_s1, %s705_s29 }
  0x13   : > { %p712_p5 = scmp.lt.u32.totalorder %s705_s29, %s1114_s1 }
  0x14   : > { %p707_p13 = pneg %p913_p11 }
  0x16   : > { %p708_p0 = pnand %p707_p13, %p706_p12 }
  0x18   : > { %p709_p3 = pneg %p708_p0 }
  0x1a   : > { %p714_p7 = pnand %p712_p5, %p709_p3 }
  0x1c   : > { %717 = shalt.err (!%p714_p7)
}
  0x1d   : > { %s718_s7 = scalar_lea.vmem %s906_s22, 8192  ;;  %p726_p2 = scmp.lt.s32.totalorder %s906_s22, %s906_s22 }
  0x1e   : > { %p719_p9 = scmp.ne.s32.totalorder %s906_s22, %s718_s7  ;;  %p727_p6 = scmp.lt.s32.totalorder %s718_s7, %s718_s7 }
  0x20   : > { %p721_p10 = pnand %p719_p9, %p707_p13  ;;  %p728_p4 = por %p727_p6, %p726_p2 }
  0x22   : > { %p722_p1 = pneg %p721_p10 }
  0x24   : > { %p729_p8 = pnand %p728_p4, %p722_p1 }
  0x26   : > { %732 = shalt.err (!%p729_p8)
}
  0x27   : > { %s836_s8 = smov 256   ;;  %s837_s9 = smov 16  }
  0x28   : > { %655 = dma.hbm_to_vmem [thread:$0]  (!%p913_p11), %s1114_s1, 8192, %s906_s22, [#allocation6], %s836_s8, %s836_s8, %s837_s9  }
  0x29   : > { %p25_p1 = scmp.eq.s32.totalorder %s24_s26, 0  ;;  %p34_p2 = scmp.ne.s32.totalorder %s829_s14, %s825_s13 }
  0x2a   : > { %p35_p4 = scmp.eq.s32.totalorder %s833_s15, 0  ;;  %p665_p6 = scmp.lt.s32.totalorder %s833_s15, 2 }
  0x2b   : > { %s952_s17 = scalar_select %p25_p1, %s829_s14, %s27_s25  }
  0x2c   : > { %p36_p8 = por %p35_p4, %p34_p2  ;;  %p1124_p10 = scmp.eq.s32.totalorder %s883_s16, 1 }
  0x2d   : > { %s148_s23 = sand.u32 1, %s829_s14   ;;  %s545_s27 = sshll.u32 %s833_s15, 11 }
  0x2e   : > { %p956_p12 = por %p1124_p10, %p34_p2  ;;  %s530_s28 = sshll.u32 %s148_s23, 7 }
  0x2f   : > { %s965_s4 = scalar_lea.hbm %s1113_s0, %s545_s27  ;;  %s152_s22 = scalar_lea.vmem [#allocation2], %s530_s28 }
  0x30   : > { %s160_s25 = sshll.u32 %s152_s22, 4  ;;  %p967_p11 = pnand %p665_p6, %p36_p8  ;;  %s971_s25 = int_to_ptr.vmem [resolvable:$true] %s160_s25 }
  0x31   : > { %s973_s5 = scalar_lea.sflag [#allocation3], %s148_s23  ;;  %s733_s6 = scalar_lea.hbm %s965_s4, 2048 }
  0x32   : > { %p734_p13 = scmp.ne.s32.totalorder %s965_s4, %s733_s6  ;;  %p735_p0 = pneg %p967_p11 }
  0x33   : > { %s738_s11 = scalar_lea.hbm %s1113_s0, 4096  ;;  %p739_p7 = scmp.lt.u32.totalorder %s965_s4, %s1113_s0 }
  0x34   : > { %p736_p3 = pnand %p735_p0, %p734_p13  ;;  %p740_p9 = scmp.lt.u32.totalorder %s738_s11, %s733_s6 }
  0x35   : > { %p742_p2 = scmp.lt.u32.totalorder %s733_s6, %s965_s4 }
  0x36   : > { %p737_p5 = pneg %p736_p3  ;;  %p741_p1 = por %p740_p9, %p739_p7 }
  0x38   : > { %p743_p4 = por %p742_p2, %p741_p1 }
  0x3a   : > { %p744_p6 = pnand %p743_p4, %p737_p5 }
  0x3c   : > { %747 = shalt.err (!%p744_p6)
}
  0x3d   : > { %s748_s23 = scalar_lea.vmem %s971_s25, 2048  ;;  %s838_s29 = smov [#allocation2]  }
  0x3e   : > { %p749_p8 = scmp.ne.s32.totalorder %s971_s25, %s748_s23  ;;  %s753_s30 = sshll.u32 %s838_s29, 4  ;;  %s754_s30 = int_to_ptr.vmem [resolvable:$false] %s753_s30 }
  0x3f   : > { %s755_s22 = scalar_lea.vmem %s754_s30, 4096  ;;  %p756_p3 = scmp.lt.s32.totalorder %s971_s25, %s754_s30 }
  0x40   : > { %p751_p10 = pnand %p749_p8, %p735_p0  ;;  %p757_p7 = scmp.lt.s32.totalorder %s755_s22, %s748_s23 }
  0x42   : > { %p752_p13 = pneg %p751_p10  ;;  %p758_p9 = por %p757_p7, %p756_p3 }
  0x44   : > { %p759_p1 = pnand %p758_p9, %p752_p13 }
  0x46   : > { %762 = shalt.err (!%p759_p1)
}
  0x47   : > { %659 = dma.hbm_to_vmem [thread:$0]  (!%p967_p11), %s965_s4, 2048, %s971_s25, %s973_s5, %s836_s8, %s836_s8, %s837_s9  }
  0x48   : > { %p1127_p0 = scmp.ne.s32.totalorder %s1122_s20, 0 }
  0x49   : > { %s1007_s6 = sand.u32 (!%p1127_p0), 1, %s825_s13   ;;  %p1128_p5 = scmp.ne.s32.totalorder (!%p1127_p0), %s1120_s18, 0 }
  0x4a   : > { %172 = sbr.rel (%p1127_p0) target bundleno = 394 (0x18a), region = 32  ;;  %s535_s7 = sshll.u32 (!%p1127_p0), %s1007_s6, 7 }
  0x4b   : > { %s175_s10 = scalar_lea.sflag (!%p1127_p0), [#allocation3], %s1007_s6  ;;  %s1013_s26 = scalar_lea.vmem (!%p1127_p0), [#allocation2], %s535_s7 }
  0x51   : > { %808 = dma.done.wait (%p1128_p5), %s175_s10, 2048  }
  0x52   : > { %810 = vsyncadd (%p1128_p5), %s175_s10, 4294965248  ;;  %p1129_p11 = scmp.eq.s32.totalorder %s883_s16, 0 }
  0x54   : > { %812 = dma.done.wait (%p1129_p11), [#allocation6], 8192   ;;  %p1130_p2 = pmov %p1129_p11 }
  0x55   : > { %v224_v0 = vld [vmem:[#allocation5 + $0x8] sm:$0xff]  ;;  %v226_v1 = vld [vmem:[#allocation5 + $0x18] sm:$0xff]  ;;  %v223_v2 = vld [vmem:[#allocation5] sm:$0xff]  ;;  %s1044_s8 = scalar_lea.vmem [#allocation7], %s535_s7  ;;  %s547_s9 = sshll.u32 %s883_s16, 11 }
  0x56   : > { %814 = vsyncadd (%p1130_p2), [#allocation6], 4294959104  ;;  %v548_v3 = vpack.c.bf16 %v226_v1, %v224_v0  ;;  %v225_v4 = vld [vmem:[#allocation5 + $0x10] sm:$0xff]  ;;  %v228_v5 = vld [vmem:[#allocation5 + $0x28] sm:$0xff]  ;;  %s443_s4 = sshll.u32 %s1044_s8, 4  ;;  %s1063_s16 = scalar_lea.hbm %s1116_s3, %s547_s9  ;;  %s1065_s4 = int_to_ptr.vmem [resolvable:$true] %s443_s4 }
  0x57   : > { %v230_v6 = vld [vmem:[#allocation5 + $0x38] sm:$0xff]  ;;  %v550_v7 = vpack.c.bf16 %v225_v4, %v223_v2  ;;  %v227_v9 = vld [vmem:[#allocation5 + $0x20] sm:$0xff]  ;;  %v229_v10 = vld [vmem:[#allocation5 + $0x30] sm:$0xff]  ;;  %s429_s11 = scalar_lea.sflag [#allocation4], %s1007_s6  ;;  %s763_s27 = scalar_lea.vmem %s1065_s4, 2048 }
  0x58   : > { %v552_v8 = vpack.c.bf16 %v230_v6, %v228_v5  ;;  %v232_v11 = vld [vmem:[#allocation5 + $0x48] sm:$0xff]  ;;  %549 = vmatprep.subr.bf16.mxu0 %v548_v3  ;;  %612 = vmatprep.subr.bf16.mxu1 %v548_v3  ;;  %v234_v12 = vld [vmem:[#allocation5 + $0x58] sm:$0xff]  ;;  %v554_v13 = vpack.c.bf16 %v229_v10, %v227_v9  ;;  %v231_v15 = vld [vmem:[#allocation5 + $0x40] sm:$0xff]  ;;  %p764_p4 = scmp.ne.s32.totalorder %s1065_s4, %s763_s27  ;;  %s839_s28 = smov [#allocation7]  }
  0x59   : > { %551 = vmatpush1.bf16.msra.mxu0 %v550_v7  ;;  %628 = vmatpush1.bf16.msra.mxu1 %v550_v7  ;;  %v556_v14 = vpack.c.bf16 %v234_v12, %v232_v11  ;;  %v233_v16 = vld [vmem:[#allocation5 + $0x50] sm:$0xff]  ;;  %v236_v17 = vld [vmem:[#allocation5 + $0x68] sm:$0xff]  ;;  %v238_v18 = vld [vmem:[#allocation5 + $0x78] sm:$0xff]  ;;  %s767_s23 = sshll.u32 %s839_s28, 4  ;;  %s768_s23 = int_to_ptr.vmem [resolvable:$false] %s767_s23 }
  0x5a   : > { %553 = vmatprep.subr.bf16.mxu0 %v552_v8  ;;  %613 = vmatprep.subr.bf16.mxu1 %v552_v8  ;;  %v558_v19 = vpack.c.bf16 %v233_v16, %v231_v15  ;;  %v560_v20 = vpack.c.bf16 %v238_v18, %v236_v17  ;;  %v235_v21 = vld [vmem:[#allocation5 + $0x60] sm:$0xff]  ;;  %v237_v22 = vld [vmem:[#allocation5 + $0x70] sm:$0xff]  ;;  %v240_v23 = vld [vmem:[#allocation5 + $0x88] sm:$0xff]  ;;  %p765_p6 = pnand %p764_p4, %p956_p12  ;;  %s769_s29 = scalar_lea.vmem %s768_s23, 4096 }
  0x5b   : > { %v242_v24 = vld [vmem:[#allocation5 + $0x98] sm:$0xff]  ;;  %v562_v25 = vpack.c.bf16 %v237_v22, %v235_v21  ;;  %v239_v27 = vld [vmem:[#allocation5 + $0x80] sm:$0xff]  ;;  %v241_v28 = vld [vmem:[#allocation5 + $0x90] sm:$0xff]  ;;  %p770_p10 = scmp.lt.s32.totalorder %s1065_s4, %s768_s23  ;;  %p771_p13 = scmp.lt.s32.totalorder %s769_s29, %s763_s27 }
  0x5c   : > { %v564_v26 = vpack.c.bf16 %v242_v24, %v240_v23  ;;  %v244_v29 = vld [vmem:[#allocation5 + $0xa8] sm:$0xff]  ;;  %v246_v30 = vld [vmem:[#allocation5 + $0xb8] sm:$0xff]  ;;  %v566_v31 = vpack.c.bf16 %v241_v28, %v239_v27  ;;  %v243_v33 = vld [vmem:[#allocation5 + $0xa0] sm:$0xff]  ;;  %p766_p8 = pneg %p765_p6 }
  0x5d   : > { %555 = vmatpush1.bf16.msra.mxu0 %v554_v13  ;;  %629 = vmatpush1.bf16.msra.mxu1 %v554_v13  ;;  %v568_v32 = vpack.c.bf16 %v246_v30, %v244_v29  ;;  %v245_v34 = vld [vmem:[#allocation5 + $0xb0] sm:$0xff]  ;;  %v248_v35 = vld [vmem:[#allocation5 + $0xc8] sm:$0xff]  ;;  %v250_v36 = vld [vmem:[#allocation5 + $0xd8] sm:$0xff]  ;;  %p772_p3 = por %p771_p13, %p770_p10 }
  0x5e   : > { %557 = vmatprep.subr.bf16.mxu0 %v556_v14  ;;  %614 = vmatprep.subr.bf16.mxu1 %v556_v14  ;;  %v570_v37 = vpack.c.bf16 %v245_v34, %v243_v33  ;;  %v247_v38 = vld [vmem:[#allocation5 + $0xc0] sm:$0xff]  ;;  %v572_v39 = vpack.c.bf16 %v250_v36, %v248_v35  ;;  %v249_v40 = vld [vmem:[#allocation5 + $0xd0] sm:$0xff]  ;;  %v208_v41 = vld [vmem:[%s1013_s26 + $0x8] sm:$0xff] }
  0x5f   : > { %v216_v42 = vld [vmem:[%s1013_s26 + $0x48] sm:$0xff]  ;;  %v254_v44 = vld [vmem:[#allocation5 + $0xf8] sm:$0xff]  ;;  %363 = vmatprep.mubr.f32.mxu0 %v208_v41  ;;  %v574_v45 = vpack.c.bf16 %v249_v40, %v247_v38  ;;  %v251_v47 = vld [vmem:[#allocation5 + $0xe0] sm:$0xff]  ;;  %p773_p7 = pnand %p772_p3, %p766_p8 }
  0x60   : > { %v252_v43 = vld [vmem:[#allocation5 + $0xe8] sm:$0xff]  ;;  %387 = vmatprep.mubr.f32.mxu1 %v216_v42  ;;  %v253_v48 = vld [vmem:[#allocation5 + $0xf0] sm:$0xff]  ;;  %v258_v50 = vld [vmem:[#allocation5 + $0x118] sm:$0xff] }
  0x61   : > { %559 = vmatpush1.bf16.msra.mxu0 %v558_v19  ;;  %630 = vmatpush1.bf16.msra.mxu1 %v558_v19  ;;  %v576_v46 = vpack.c.bf16 %v254_v44, %v252_v43  ;;  %v256_v49 = vld [vmem:[#allocation5 + $0x108] sm:$0xff]  ;;  %v578_v51 = vpack.c.bf16 %v253_v48, %v251_v47  ;;  %v255_v53 = vld [vmem:[#allocation5 + $0x100] sm:$0xff]  ;;  %v257_v54 = vld [vmem:[#allocation5 + $0x110] sm:$0xff]  ;;  %v289_v48 = vlaneseq }
  0x62   : > { %561 = vmatprep.subr.bf16.mxu0 %v560_v20  ;;  %615 = vmatprep.subr.bf16.mxu1 %v560_v20  ;;  %v580_v52 = vpack.c.bf16 %v258_v50, %v256_v49  ;;  %v260_v55 = vld [vmem:[#allocation5 + $0x128] sm:$0xff]  ;;  %v262_v56 = vld [vmem:[#allocation5 + $0x138] sm:$0xff]  ;;  %v582_v57 = vpack.c.bf16 %v257_v54, %v255_v53  ;;  %v259_v59 = vld [vmem:[#allocation5 + $0x120] sm:$0xff] }
  0x63   : > { %v584_v58 = vpack.c.bf16 %v262_v56, %v260_v55  ;;  %v261_v60 = vld [vmem:[#allocation5 + $0x130] sm:$0xff]  ;;  %v264_v61 = vld [vmem:[#allocation5 + $0x148] sm:$0xff]  ;;  %v266_v62 = vld [vmem:[#allocation5 + $0x158] sm:$0xff]  ;;  %v290_v49 = vshrl.u32 %v289_v48, 7 }
  0x64   : > { %v586_v63 = vpack.c.bf16 %v261_v60, %v259_v59  ;;  %v588_v0 = vpack.c.bf16 %v266_v62, %v264_v61  ;;  %v263_v1 = vld [vmem:[#allocation5 + $0x140] sm:$0xff]  ;;  %v265_v2 = vld [vmem:[#allocation5 + $0x150] sm:$0xff]  ;;  %v268_v3 = vld [vmem:[#allocation5 + $0x168] sm:$0xff] }
  0x65   : > { %563 = vmatpush1.bf16.msra.mxu0 %v562_v25  ;;  %631 = vmatpush1.bf16.msra.mxu1 %v562_v25  ;;  %v270_v4 = vld [vmem:[#allocation5 + $0x178] sm:$0xff]  ;;  %v590_v5 = vpack.c.bf16 %v265_v2, %v263_v1  ;;  %v267_v7 = vld [vmem:[#allocation5 + $0x160] sm:$0xff]  ;;  %v269_v8 = vld [vmem:[#allocation5 + $0x170] sm:$0xff]  ;;  %v291_v50 = vsub.s32 0, %v290_v49 }
  0x66   : > { %565 = vmatprep.subr.bf16.mxu0 %v564_v26  ;;  %616 = vmatprep.subr.bf16.mxu1 %v564_v26  ;;  %v592_v6 = vpack.c.bf16 %v270_v4, %v268_v3  ;;  %v272_v9 = vld [vmem:[#allocation5 + $0x188] sm:$0xff]  ;;  %v274_v10 = vld [vmem:[#allocation5 + $0x198] sm:$0xff]  ;;  %v594_v11 = vpack.c.bf16 %v269_v8, %v267_v7  ;;  %v271_v13 = vld [vmem:[#allocation5 + $0x180] sm:$0xff] }
  0x67   : > { %v596_v12 = vpack.c.bf16 %v274_v10, %v272_v9  ;;  %v273_v14 = vld [vmem:[#allocation5 + $0x190] sm:$0xff]  ;;  %v276_v15 = vld [vmem:[#allocation5 + $0x1a8] sm:$0xff]  ;;  %v278_v16 = vld [vmem:[#allocation5 + $0x1b8] sm:$0xff] }
  0x68   : > { %v598_v17 = vpack.c.bf16 %v273_v14, %v271_v13  ;;  %v600_v18 = vpack.c.bf16 %v278_v16, %v276_v15  ;;  %v275_v19 = vld [vmem:[#allocation5 + $0x1a0] sm:$0xff]  ;;  %v277_v20 = vld [vmem:[#allocation5 + $0x1b0] sm:$0xff]  ;;  %v280_v21 = vld [vmem:[#allocation5 + $0x1c8] sm:$0xff] }
  0x69   : > { %567 = vmatpush1.bf16.msra.mxu0 %v566_v31  ;;  %632 = vmatpush1.bf16.msra.mxu1 %v566_v31  ;;  %v282_v22 = vld [vmem:[#allocation5 + $0x1d8] sm:$0xff]  ;;  %v602_v23 = vpack.c.bf16 %v277_v20, %v275_v19  ;;  %v279_v25 = vld [vmem:[#allocation5 + $0x1c0] sm:$0xff]  ;;  %v281_v26 = vld [vmem:[#allocation5 + $0x1d0] sm:$0xff] }
  0x6a   : > { %569 = vmatprep.subr.bf16.mxu0 %v568_v32  ;;  %617 = vmatprep.subr.bf16.mxu1 %v568_v32  ;;  %v604_v24 = vpack.c.bf16 %v282_v22, %v280_v21  ;;  %v284_v27 = vld [vmem:[#allocation5 + $0x1e8] sm:$0xff]  ;;  %v286_v28 = vld [vmem:[#allocation5 + $0x1f8] sm:$0xff]  ;;  %v606_v29 = vpack.c.bf16 %v281_v26, %v279_v25  ;;  %v283_v31 = vld [vmem:[#allocation5 + $0x1e0] sm:$0xff] }
  0x6b   : > { %v608_v30 = vpack.c.bf16 %v286_v28, %v284_v27  ;;  %v285_v32 = vld [vmem:[#allocation5 + $0x1f0] sm:$0xff]  ;;  %v207_v34 = vld [vmem:[%s1013_s26] sm:$0xff]  ;;  %v210_v36 = vld [vmem:[%s1013_s26 + $0x18] sm:$0xff] }
  0x6c   : > { %v610_v33 = vpack.c.bf16 %v285_v32, %v283_v31  ;;  %v215_v35 = vld [vmem:[%s1013_s26 + $0x40] sm:$0xff]  ;;  %v209_v38 = vld [vmem:[%s1013_s26 + $0x10] sm:$0xff]  ;;  %v212_v40 = vld [vmem:[%s1013_s26 + $0x28] sm:$0xff] }
  0x6d   : > { %571 = vmatpush1.bf16.msra.mxu0 %v570_v37  ;;  %633 = vmatpush1.bf16.msra.mxu1 %v570_v37  ;;  %v218_v37 = vld [vmem:[%s1013_s26 + $0x58] sm:$0xff]  ;;  %v220_v41 = vld [vmem:[%s1013_s26 + $0x68] sm:$0xff]  ;;  %v211_v42 = vld [vmem:[%s1013_s26 + $0x20] sm:$0xff] }
  0x6e   : > { %573 = vmatprep.subr.bf16.mxu0 %v572_v39  ;;  %618 = vmatprep.subr.bf16.mxu1 %v572_v39  ;;  %v217_v39 = vld [vmem:[%s1013_s26 + $0x50] sm:$0xff]  ;;  %v219_v43 = vld [vmem:[%s1013_s26 + $0x60] sm:$0xff]  ;;  %v214_v44 = vld [vmem:[%s1013_s26 + $0x38] sm:$0xff] }
  0x6f   : > { %v221_v47 = vld [vmem:[%s1013_s26 + $0x70] sm:$0xff] }
  0x71   : > { %575 = vmatpush1.bf16.msra.mxu0 %v574_v45  ;;  %634 = vmatpush1.bf16.msra.mxu1 %v574_v45  ;;  %v222_v45 = vld [vmem:[%s1013_s26 + $0x78] sm:$0xff] }
  0x72   : > { %577 = vmatprep.subr.bf16.mxu0 %v576_v46  ;;  %619 = vmatprep.subr.bf16.mxu1 %v576_v46  ;;  %v213_v46 = vld [vmem:[%s1013_s26 + $0x30] sm:$0xff] }
  0x75   : > { %579 = vmatpush1.bf16.msra.mxu0 %v578_v51  ;;  %635 = vmatpush1.bf16.msra.mxu1 %v578_v51  ;;  %v287_v51 = vld [vmem:[%s1115_s2] sm:$0x3] }
  0x76   : > { %581 = vmatprep.subr.bf16.mxu0 %v580_v52  ;;  %620 = vmatprep.subr.bf16.mxu1 %v580_v52  ;;  %v295_v52 = vsub.s32 1, %v290_v49  ;;  %v292_v53 = vrot.slane %v287_v51, %v291_v50 }
  0x78   : > { %v296_v54 = vrot.slane %v287_v51, %v295_v52 }
  0x79   : > { %583 = vmatpush1.bf16.msra.mxu0 %v582_v57  ;;  %636 = vmatpush1.bf16.msra.mxu1 %v582_v57 }
  0x7a   : > { %585 = vmatprep.subr.bf16.mxu0 %v584_v58  ;;  %621 = vmatprep.subr.bf16.mxu1 %v584_v58 }
  0x7d   : > { %587 = vmatpush1.bf16.msra.mxu0 %v586_v63  ;;  %637 = vmatpush1.bf16.msra.mxu1 %v586_v63 }
  0x7e   : > { %589 = vmatprep.subr.bf16.mxu0 %v588_v0  ;;  %622 = vmatprep.subr.bf16.mxu1 %v588_v0 }
  0x81   : > { %591 = vmatpush1.bf16.msra.mxu0 %v590_v5  ;;  %638 = vmatpush1.bf16.msra.mxu1 %v590_v5 }
  0x82   : > { %593 = vmatprep.subr.bf16.mxu0 %v592_v6  ;;  %623 = vmatprep.subr.bf16.mxu1 %v592_v6 }
  0x85   : > { %595 = vmatpush1.bf16.msra.mxu0 %v594_v11  ;;  %639 = vmatpush1.bf16.msra.mxu1 %v594_v11 }
  0x86   : > { %597 = vmatprep.subr.bf16.mxu0 %v596_v12  ;;  %624 = vmatprep.subr.bf16.mxu1 %v596_v12 }
  0x89   : > { %599 = vmatpush1.bf16.msra.mxu0 %v598_v17  ;;  %640 = vmatpush1.bf16.msra.mxu1 %v598_v17 }
  0x8a   : > { %601 = vmatprep.subr.bf16.mxu0 %v600_v18  ;;  %625 = vmatprep.subr.bf16.mxu1 %v600_v18 }
  0x8d   : > { %603 = vmatpush1.bf16.msra.mxu0 %v602_v23  ;;  %641 = vmatpush1.bf16.msra.mxu1 %v602_v23 }
  0x8e   : > { %605 = vmatprep.subr.bf16.mxu0 %v604_v24  ;;  %626 = vmatprep.subr.bf16.mxu1 %v604_v24 }
  0x91   : > { %607 = vmatpush1.bf16.msra.mxu0 %v606_v29  ;;  %642 = vmatpush1.bf16.msra.mxu1 %v606_v29 }
  0x92   : > { %609 = vmatprep.subr.bf16.mxu0 %v608_v30  ;;  %627 = vmatprep.subr.bf16.mxu1 %v608_v30 }
  0x95   : > { %611 = vmatpush1.bf16.msra.mxu0 %v610_v33  ;;  %643 = vmatpush1.bf16.msra.mxu1 %v610_v33 }
  0x98   : > { %364 = vmatmul.mubr.f32.vlgmr.msra.gmra.mrb[0].mxu0 %v207_v34  ;;  %388 = vmatmul.mubr.f32.vlgmr.msra.gmra.mrb[0].mxu1 %v215_v35 }
  0x99   : > { %369 = vmatprep.mubr.f32.mxu0 %v210_v36  ;;  %393 = vmatprep.mubr.f32.mxu1 %v218_v37 }
  0x9c   : > { %370 = vmatmul.mubr.f32.gmra.mrb[2].mxu0 %v209_v38  ;;  %394 = vmatmul.mubr.f32.gmra.mrb[2].mxu1 %v217_v39 }
  0x9d   : > { %375 = vmatprep.mubr.f32.mxu0 %v212_v40  ;;  %399 = vmatprep.mubr.f32.mxu1 %v220_v41 }
  0xa0   : > { %376 = vmatmul.mubr.f32.gmra.mrb[4].mxu0 %v211_v42  ;;  %400 = vmatmul.mubr.f32.gmra.mrb[4].mxu1 %v219_v43 }
  0xa1   : > { %381 = vmatprep.mubr.f32.mxu0 %v214_v44  ;;  %405 = vmatprep.mubr.f32.mxu1 %v222_v45 }
  0xa4   : > { %382 = vmatmul.mubr.f32.gmra.mrb[6].mxu0 %v213_v46  ;;  %406 = vmatmul.mubr.f32.gmra.mrb[6].mxu1 %v221_v47 }
 0x16b   : > { %v365_v55 = vpop.f32.mrb[0].mxu0  ;;  %v389_v56 = vpop.f32.mrb[0].mxu1 }
 0x16c   : > { %v366_v57 = vadd.f32 %v365_v55, %v292_v53  ;;  %v390_v58 = vadd.f32 %v389_v56, %v292_v53  ;;  %v367_v59 = vpop.f32.mrb[1].mxu0  ;;  %v391_v60 = vpop.f32.mrb[1].mxu1 }
 0x16d   : > { %v368_v61 = vadd.f32 %v367_v59, %v296_v54  ;;  %v392_v62 = vadd.f32 %v391_v60, %v296_v54 }
 0x16e   : > { %412 = vst [vmem:[%s1044_s8] sm:$0xff] %v366_v57  ;;  %420 = vst [vmem:[%s1044_s8 + $0x40] sm:$0xff] %v390_v58 }
 0x16f   : > { %413 = vst [vmem:[%s1044_s8 + $0x8] sm:$0xff] %v368_v61  ;;  %421 = vst [vmem:[%s1044_s8 + $0x48] sm:$0xff] %v392_v62  ;;  %v371_v63 = vpop.f32.mrb[2].mxu0  ;;  %v395_v0 = vpop.f32.mrb[2].mxu1 }
 0x170   : > { %v372_v1 = vadd.f32 %v371_v63, %v292_v53  ;;  %v396_v2 = vadd.f32 %v395_v0, %v292_v53  ;;  %v373_v3 = vpop.f32.mrb[3].mxu0  ;;  %v397_v4 = vpop.f32.mrb[3].mxu1 }
 0x171   : > { %v374_v5 = vadd.f32 %v373_v3, %v296_v54  ;;  %v398_v6 = vadd.f32 %v397_v4, %v296_v54 }
 0x172   : > { %414 = vst [vmem:[%s1044_s8 + $0x10] sm:$0xff] %v372_v1  ;;  %422 = vst [vmem:[%s1044_s8 + $0x50] sm:$0xff] %v396_v2 }
 0x173   : > { %415 = vst [vmem:[%s1044_s8 + $0x18] sm:$0xff] %v374_v5  ;;  %423 = vst [vmem:[%s1044_s8 + $0x58] sm:$0xff] %v398_v6  ;;  %v377_v7 = vpop.f32.mrb[4].mxu0  ;;  %v401_v8 = vpop.f32.mrb[4].mxu1 }
 0x174   : > { %v378_v9 = vadd.f32 %v377_v7, %v292_v53  ;;  %v402_v10 = vadd.f32 %v401_v8, %v292_v53  ;;  %v379_v11 = vpop.f32.mrb[5].mxu0  ;;  %v403_v12 = vpop.f32.mrb[5].mxu1 }
 0x175   : > { %v380_v13 = vadd.f32 %v379_v11, %v296_v54  ;;  %v404_v14 = vadd.f32 %v403_v12, %v296_v54 }
 0x176   : > { %416 = vst [vmem:[%s1044_s8 + $0x20] sm:$0xff] %v378_v9  ;;  %424 = vst [vmem:[%s1044_s8 + $0x60] sm:$0xff] %v402_v10 }
 0x177   : > { %417 = vst [vmem:[%s1044_s8 + $0x28] sm:$0xff] %v380_v13  ;;  %425 = vst [vmem:[%s1044_s8 + $0x68] sm:$0xff] %v404_v14  ;;  %v383_v15 = vpop.f32.mrb[6].mxu0  ;;  %v407_v16 = vpop.f32.mrb[6].mxu1 }
 0x178   : > { %v384_v17 = vadd.f32 %v383_v15, %v292_v53  ;;  %v408_v18 = vadd.f32 %v407_v16, %v292_v53  ;;  %v385_v19 = vpop.f32.mrb[7].mxu0  ;;  %v409_v20 = vpop.f32.mrb[7].mxu1 }
 0x179   : > { %v386_v21 = vadd.f32 %v385_v19, %v296_v54  ;;  %v410_v22 = vadd.f32 %v409_v20, %v296_v54 }
 0x17a   : > { %418 = vst [vmem:[%s1044_s8 + $0x30] sm:$0xff] %v384_v17  ;;  %426 = vst [vmem:[%s1044_s8 + $0x70] sm:$0xff] %v408_v18 }
 0x17b   : > { %419 = vst [vmem:[%s1044_s8 + $0x38] sm:$0xff] %v386_v21  ;;  %427 = vst [vmem:[%s1044_s8 + $0x78] sm:$0xff] %v410_v22 }
 0x17c   : > { %776 = shalt.err (!%p773_p7)
}
 0x17d   : > { %s777_s30 = scalar_lea.hbm %s1063_s16, 2048  ;;  %s781_s10 = scalar_lea.hbm %s1116_s3, 4096 }
 0x17e   : > { %p778_p9 = scmp.ne.s32.totalorder %s1063_s16, %s777_s30  ;;  %p782_p5 = scmp.lt.u32.totalorder %s1063_s16, %s1116_s3 }
 0x17f   : > { %p783_p11 = scmp.lt.u32.totalorder %s781_s10, %s777_s30  ;;  %p785_p4 = scmp.lt.u32.totalorder %s777_s30, %s1063_s16 }
 0x180   : > { %p779_p1 = pnand %p778_p9, %p956_p12 }
 0x181   : > { %p784_p2 = por %p783_p11, %p782_p5 }
 0x182   : > { %p780_p0 = pneg %p779_p1 }
 0x183   : > { %p786_p6 = por %p785_p4, %p784_p2 }
 0x185   : > { %p787_p8 = pnand %p786_p6, %p780_p0 }
 0x187   : > { %790 = shalt.err (!%p787_p8)
}
 0x188   : > { %s840_s20 = smov 256   ;;  %s841_s8 = smov 16  }
 0x189   : > { %650 = dma.vmem_to_hbm [thread:$0]  (%p956_p12), %s1065_s4, 2048, %s1063_s16, %s429_s11, %s840_s20, %s840_s20, %s841_s8  }
 0x18a PF: > { %s458_s9 = sand.u32 1, %s821_s12   ;;  %p1131_p10 = scmp.ne.s32.totalorder %s1121_s19, 0 }
 0x18b   : > { %p1132_p13 = scmp.ge.s32.totalorder %s833_s15, 2  ;;  %s459_s25 = scalar_lea.sflag [#allocation4], %s458_s9 }
 0x18d   : > { %p661_p3 = pnand %p1132_p13, %p1131_p10 }
 0x18f   : > { %816 = dma.done.wait (!%p661_p3), %s459_s25, 2048  }
 0x190   : > { %818 = vsyncadd (!%p661_p3), %s459_s25, 4294965248  ;;  %p17_p7 = scmp.ge.s32.totalorder %s918_s24, 4   ;;  %s1133_s12 = smov %s825_s13 }
 0x191   : > { %s1134_s13 = smov %s829_s14  ;;  %s1135_s14 = smov %s952_s17 }
 0x192   : > { %s1136_s15 = smov %s918_s24  ;;  %19 = sbr.rel (!%p17_p7) target bundleno = 6 (0x6), region = 81 }
 0x199   :  { %464 = vsyncpa [#allocation3], 1 }
 0x19a   :  { %466 = vsyncpa [#allocation3 + $0x1], 1 }
 0x19b   :  { %467 = vsyncpa [#allocation6], 1 }
 0x19c   :  { %468 = vsyncpa [#allocation4], 1 }
 0x19d   :  { %470 = vsyncpa [#allocation4 + $0x1], 1 }

</bundles_post_ra>
